<compile_context>
chip_gen: v6e
topology: v6e:2x2x1
jax: 0.10.0
libtpu: 0.0.40
codegen_flags: <defaults>
</compile_context>

<pallas_src>
import jax
import jax.numpy as jnp
from jax.experimental import pallas as pl
from jax.experimental.pallas import tpu as pltpu

_SQRT_2_OVER_PI = 0.7978845608028654


def _gelu_tanh(h):
    # tanh-form GELU (== torch.nn.GELU(approximate='tanh')).
    # TODO(synk): torch.nn.GELU() default is the exact erf form; the tanh form is
    # used here to stay on guaranteed-lowering EUP ops (difference < ~1e-3).
    return 0.5 * h * (1.0 + jnp.tanh(_SQRT_2_OVER_PI * (h + 0.044715 * (h * h * h))))


def _ffn_kernel(x_ref, w1_ref, b1_ref, w2_ref, b2_ref, o_ref):
    # x_ref: (tm, d_model), w1_ref: (d_ff, d_model), b1_ref: (1, d_ff),
    # w2_ref: (d_out, d_ff), b2_ref: (1, d_out), o_ref: (tm, d_out)
    x = x_ref[...]  # native dtype straight into the MXU

    # h = x @ W1^T : contract dim 1 of both operands (PyTorch weight layout kept).
    h = jax.lax.dot_general(
        x, w1_ref[...],
        dimension_numbers=(((1,), (1,)), ((), ())),
        preferred_element_type=jnp.float32,
    )
    h = h + b1_ref[...].astype(jnp.float32)

    g = _gelu_tanh(h)

    # TODO(synk): nn.Dropout(0.1) is identity in eval mode; training-mode dropout
    # would use pltpu.prng_seed / pltpu.stateful_bernoulli here.
    # TODO(synk): is_gated=True variant (g * linear_v(x)) not implemented; the
    # module default is non-gated.

    # y = g @ W2^T : again contract dim 1 of both operands.
    y = jax.lax.dot_general(
        g.astype(w2_ref.dtype), w2_ref[...],
        dimension_numbers=(((1,), (1,)), ((), ())),
        preferred_element_type=jnp.float32,
    )
    o_ref[...] = (y + b2_ref[...].astype(jnp.float32)).astype(o_ref.dtype)


def feed_forward(x, w1, b1, w2, b2, *, block_rows=256):
    """FFN forward.

    x : (..., d_model)
    w1: (d_ff, d_model)   b1: (d_ff,)      -- PyTorch nn.Linear layout
    w2: (d_out, d_ff)     b2: (d_out,)
    returns (..., d_out)
    """
    *lead, d_model = x.shape
    d_ff, _ = w1.shape
    d_out, _ = w2.shape

    n = 1
    for s in lead:
        n *= s
    x2 = x.reshape(n, d_model)          # metadata-only reshape, no HBM traffic
    b1r = b1.reshape(1, d_ff)
    b2r = b2.reshape(1, d_out)

    tm = min(block_rows, n)
    grid = (pl.cdiv(n, tm),)

    out = pl.pallas_call(
        _ffn_kernel,
        out_shape=jax.ShapeDtypeStruct((n, d_out), x.dtype),
        grid_spec=pltpu.PrefetchScalarGridSpec(
            num_scalar_prefetch=0,
            grid=grid,
            in_specs=[
                pl.BlockSpec((tm, d_model), lambda i: (i, 0)),     # x row tile
                pl.BlockSpec((d_ff, d_model), lambda i: (0, 0)),   # W1 (resident)
                pl.BlockSpec((1, d_ff), lambda i: (0, 0)),         # b1 (resident)
                pl.BlockSpec((d_out, d_ff), lambda i: (0, 0)),     # W2 (resident)
                pl.BlockSpec((1, d_out), lambda i: (0, 0)),        # b2 (resident)
            ],
            out_specs=pl.BlockSpec((tm, d_out), lambda i: (i, 0)),
        ),
        compiler_params=pltpu.CompilerParams(
            dimension_semantics=("parallel",),
        ),
    )(x2, w1, b1r, w2, b2r)

    return out.reshape(*lead, d_out)


def _reference(x, w1, b1, w2, b2):
    h = jnp.dot(x, w1.T) + b1
    g = _gelu_tanh(h)
    return jnp.dot(g, w2.T) + b2


if __name__ == "__main__":
    key = jax.random.PRNGKey(0)
    kx, kw1, kb1, kw2, kb2 = jax.random.split(key, 5)

    B, L, d_model, d_ff = 2, 8, 32, 64
    d_out = d_model

    x = jax.random.normal(kx, (B, L, d_model), dtype=jnp.float32)
    w1 = jax.random.normal(kw1, (d_ff, d_model), dtype=jnp.float32) * 0.1
    b1 = jax.random.normal(kb1, (d_ff,), dtype=jnp.float32) * 0.1
    # NOTE: the PyTorch module zero-inits layer2.weight; random weights are used
    # here so the numerical check actually exercises both matmuls (forward
    # semantics are independent of initialization).
    w2 = jax.random.normal(kw2, (d_out, d_ff), dtype=jnp.float32) * 0.1
    b2 = jax.random.normal(kb2, (d_out,), dtype=jnp.float32) * 0.1

    y = feed_forward(x, w1, b1, w2, b2)
    y = jax.block_until_ready(y)

    y_ref = _reference(x, w1, b1, w2, b2)
    assert y.shape == (B, L, d_out)
    assert jnp.allclose(y, y_ref, atol=1e-4, rtol=1e-4), "mismatch vs reference"

    print("KERNEL_OK")
</pallas_src>

<mosaic_0001>
module attributes {stable_mosaic.version = 11 : i64} {
  func.func @_ffn_kernel(%arg0: i32, %arg1: memref<16x32xf32, #tpu.memory_space<vmem>>, %arg2: memref<64x32xf32, #tpu.memory_space<vmem>>, %arg3: memref<1x64xf32, #tpu.memory_space<vmem>>, %arg4: memref<32x64xf32, #tpu.memory_space<vmem>>, %arg5: memref<1x32xf32, #tpu.memory_space<vmem>>, %arg6: memref<16x32xf32, #tpu.memory_space<vmem>>) attributes {dimension_semantics = [#tpu.dimension_semantics<parallel>], iteration_bounds = array<i64: 1>, scalar_prefetch = 0 : i64, scratch_operands = 0 : i64, tpu.core_type = #tpu.core_type<tc>, window_params = [{transform_indices = @transform_0, window_bounds = array<i64: 16, 32>}, {pipeline_mode = #tpu.pipeline_mode<synchronous>, transform_indices = @transform_1, window_bounds = array<i64: 64, 32>}, {pipeline_mode = #tpu.pipeline_mode<synchronous>, transform_indices = @transform_2, window_bounds = array<i64: 1, 64>}, {pipeline_mode = #tpu.pipeline_mode<synchronous>, transform_indices = @transform_3, window_bounds = array<i64: 32, 64>}, {pipeline_mode = #tpu.pipeline_mode<synchronous>, transform_indices = @transform_4, window_bounds = array<i64: 1, 32>}, {transform_indices = @transform_5, window_bounds = array<i64: 16, 32>}]} {
    %c0 = arith.constant 0 : index
    %c0_0 = arith.constant 0 : index
    %0 = vector.load %arg1[%c0, %c0_0] : memref<16x32xf32, #tpu.memory_space<vmem>>, vector<16x32xf32>
    %c0_1 = arith.constant 0 : index
    %c0_2 = arith.constant 0 : index
    %1 = vector.load %arg2[%c0_1, %c0_2] : memref<64x32xf32, #tpu.memory_space<vmem>>, vector<64x32xf32>
    %cst = arith.constant dense<0.000000e+00> : vector<16x64xf32>
    %2 = tpu.matmul %0, %1, %cst {dimension_numbers = #tpu.dot_dimension_numbers<[1], [1], [0], [0], [0, 0, 1, 0], [], []>} : vector<16x32xf32>, vector<64x32xf32>, vector<16x64xf32> -> vector<16x64xf32>
    %c0_3 = arith.constant 0 : index
    %c0_4 = arith.constant 0 : index
    %3 = vector.load %arg3[%c0_3, %c0_4] : memref<1x64xf32, #tpu.memory_space<vmem>>, vector<1x64xf32>
    %4 = vector.broadcast %3 : vector<1x64xf32> to vector<16x64xf32>
    %5 = arith.addf %2, %4 : vector<16x64xf32>
    %cst_5 = arith.constant 5.000000e-01 : f32
    %6 = vector.broadcast %cst_5 : f32 to vector<16x64xf32>
    %7 = arith.mulf %6, %5 : vector<16x64xf32>
    %8 = arith.mulf %5, %5 : vector<16x64xf32>
    %9 = arith.mulf %8, %5 : vector<16x64xf32>
    %cst_6 = arith.constant 4.471500e-02 : f32
    %10 = vector.broadcast %cst_6 : f32 to vector<16x64xf32>
    %11 = arith.mulf %10, %9 : vector<16x64xf32>
    %12 = arith.addf %5, %11 : vector<16x64xf32>
    %cst_7 = arith.constant 0.797884583 : f32
    %13 = vector.broadcast %cst_7 : f32 to vector<16x64xf32>
    %14 = arith.mulf %13, %12 : vector<16x64xf32>
    %15 = math.tanh %14 : vector<16x64xf32>
    %cst_8 = arith.constant 1.000000e+00 : f32
    %16 = vector.broadcast %cst_8 : f32 to vector<16x64xf32>
    %17 = arith.addf %16, %15 : vector<16x64xf32>
    %18 = arith.mulf %7, %17 : vector<16x64xf32>
    %c0_9 = arith.constant 0 : index
    %c0_10 = arith.constant 0 : index
    %19 = vector.load %arg4[%c0_9, %c0_10] : memref<32x64xf32, #tpu.memory_space<vmem>>, vector<32x64xf32>
    %cst_11 = arith.constant dense<0.000000e+00> : vector<16x32xf32>
    %20 = tpu.matmul %18, %19, %cst_11 {dimension_numbers = #tpu.dot_dimension_numbers<[1], [1], [0], [0], [0, 0, 1, 0], [], []>} : vector<16x64xf32>, vector<32x64xf32>, vector<16x32xf32> -> vector<16x32xf32>
    %c0_12 = arith.constant 0 : index
    %c0_13 = arith.constant 0 : index
    %21 = vector.load %arg5[%c0_12, %c0_13] : memref<1x32xf32, #tpu.memory_space<vmem>>, vector<1x32xf32>
    %22 = vector.broadcast %21 : vector<1x32xf32> to vector<16x32xf32>
    %23 = arith.addf %20, %22 : vector<16x32xf32>
    %c0_14 = arith.constant 0 : index
    %c0_15 = arith.constant 0 : index
    %24 = vector.load %arg6[%c0_14, %c0_15] : memref<16x32xf32, #tpu.memory_space<vmem>>, vector<16x32xf32>
    tpu.vector_store %arg6[%c0_14, %c0_15], %23 {strides = array<i32>} : memref<16x32xf32, #tpu.memory_space<vmem>>, vector<16x32xf32>,
    return
  }
  func.func @transform_0(%arg0: i32) -> (i32, i32) {
    %c0_i32 = arith.constant 0 : i32
    %c0_i32_0 = arith.constant 0 : i32
    return %arg0, %c0_i32 : i32, i32
  }
  func.func @transform_1(%arg0: i32) -> (i32, i32) {
    %c0_i32 = arith.constant 0 : i32
    %c0_i32_0 = arith.constant 0 : i32
    %c0_i32_1 = arith.constant 0 : i32
    return %c0_i32, %c0_i32_0 : i32, i32
  }
  func.func @transform_2(%arg0: i32) -> (i32, i32) {
    %c0_i32 = arith.constant 0 : i32
    %c0_i32_0 = arith.constant 0 : i32
    %c0_i32_1 = arith.constant 0 : i32
    return %c0_i32, %c0_i32_0 : i32, i32
  }
  func.func @transform_3(%arg0: i32) -> (i32, i32) {
    %c0_i32 = arith.constant 0 : i32
    %c0_i32_0 = arith.constant 0 : i32
    %c0_i32_1 = arith.constant 0 : i32
    return %c0_i32, %c0_i32_0 : i32, i32
  }
  func.func @transform_4(%arg0: i32) -> (i32, i32) {
    %c0_i32 = arith.constant 0 : i32
    %c0_i32_0 = arith.constant 0 : i32
    %c0_i32_1 = arith.constant 0 : i32
    return %c0_i32, %c0_i32_0 : i32, i32
  }
  func.func @transform_5(%arg0: i32) -> (i32, i32) {
    %c0_i32 = arith.constant 0 : i32
    %c0_i32_0 = arith.constant 0 : i32
    return %arg0, %c0_i32 : i32, i32
  }
}

</mosaic_0001>

<bundles_post_ra>
// kernel: tpu_custom_call.1
= control target key start
LH: loop header
LB: loop body
LE: loop exit
PB: predicated region body
PF: predicated region fallthrough
CT: control target
= control target key end

     0   :  { %vm38_vm0 = vcmask 261120   ;;  %s492_s0 = inlined_call_operand.vmem [shape: f32[16,32], index: 0, kind: input, shape index: {}]   ;;  %s493_s1 = inlined_call_operand.vmem [shape: f32[64,32], index: 1, kind: input, shape index: {}]   ;;  %s494_s2 = inlined_call_operand.vmem [shape: f32[1,64], index: 2, kind: input, shape index: {}]   ;;  %s495_s3 = inlined_call_operand.vmem [shape: f32[32,64], index: 3, kind: input, shape index: {}]   ;;  %s496_s4 = inlined_call_operand.vmem [shape: f32[1,32], index: 4, kind: input, shape index: {}]   ;;  %s497_s5 = inlined_call_operand.hbm [shape: f32[16,32], index: 5, kind: output, shape index: {}]  }
   0x1   :  { %v30_v0 = vld [vmem:[%s493_s1 + $0x38] sm:$0xff]  ;;  %v29_v1 = vld [vmem:[%s493_s1 + $0x30] sm:$0xff]  ;;  %v21_v2 = vld [vmem:[%s492_s0] sm:$0xff] }
   0x2   :  { %319 = vmatprep.subr.msk.mxu0 %vm38_vm0, %v30_v0  ;;  %335 = vmatprep.mubr.msk.f32.mxu0 %vm38_vm0, %v21_v2 }
   0x3   :  { %320 = vmatpush3.xpose.msk.msra.mxu0 %vm38_vm0, %v30_v0 }
   0x4   :  { %321 = vmatprep.subr.msk.mxu0 %vm38_vm0, %v29_v1 }
   0x5   :  { %10 = vsyncpa [#allocation3], 0  ;;  %v28_v3 = vld [vmem:[%s493_s1 + $0x28] sm:$0xff]  ;;  %v27_v4 = vld [vmem:[%s493_s1 + $0x20] sm:$0xff]  ;;  %vm173_vm1 = vcmask 523264   ;;  %s378_s21 = smov [#allocation2]  }
   0x6   :  { %v26_v5 = vld [vmem:[%s493_s1 + $0x18] sm:$0xff]  ;;  %v25_v6 = vld [vmem:[%s493_s1 + $0x10] sm:$0xff]  ;;  %v24_v7 = vld [vmem:[%s493_s1 + $0x8] sm:$0xff]  ;;  %s274_s22 = sshll.u32 %s378_s21, 4  ;;  %s275_s22 = int_to_ptr.vmem [resolvable:$true] %s274_s22 }
   0x7   :  { %322 = vmatpush3.xpose.msk.msra.mxu0 %vm38_vm0, %v29_v1  ;;  %v23_v8 = vld [vmem:[%s493_s1] sm:$0xff]  ;;  %v22_v9 = vld [vmem:[%s492_s0 + $0x8] sm:$0xff]  ;;  %v165_v10 = vld [vmem:[%s495_s3 + $0x18] sm:$0xff]  ;;  %s356_s23 = scalar_lea.vmem %s275_s22, 256  ;;  %p361_p1 = scmp.lt.s32.totalorder %s275_s22, %s275_s22 }
   0x8   :  { %323 = vmatprep.subr.msk.mxu0 %vm38_vm0, %v28_v3  ;;  %v164_v11 = vld [vmem:[%s495_s3 + $0x10] sm:$0xff]  ;;  %338 = vmatprep.subr.msk.mxu1 %vm173_vm1, %v165_v10  ;;  %v163_v12 = vld [vmem:[%s495_s3 + $0x8] sm:$0xff]  ;;  %v162_v13 = vld [vmem:[%s495_s3] sm:$0xff]  ;;  %p357_p0 = scmp.ne.s32.totalorder %s275_s22, %s356_s23  ;;  %p362_p2 = scmp.lt.s32.totalorder %s356_s23, %s356_s23 }
   0x9   :  { %339 = vmatpush3.xpose.msk.msra.mxu1 %vm173_vm1, %v165_v10  ;;  %v285_v14 = vld [vmem:[%s494_s2] ss:$0 sm:$0xff] }
   0xa   :  { %340 = vmatprep.subr.msk.mxu1 %vm173_vm1, %v164_v11  ;;  %v296_v37 = vld [vmem:[%s496_s4] ss:$0 sm:$0xff]  ;;  %p363_p3 = por %p362_p2, %p361_p1 }
   0xb   :  { %324 = vmatpush3.xpose.msk.msra.mxu0 %vm38_vm0, %v28_v3 }
   0xc   :  { %325 = vmatprep.subr.msk.mxu0 %vm38_vm0, %v27_v4  ;;  %p364_p4 = pnand %p363_p3, %p357_p0 }
   0xd   :  { %341 = vmatpush3.xpose.msk.msra.mxu1 %vm173_vm1, %v164_v11 }
   0xe   :  { %342 = vmatprep.subr.msk.mxu1 %vm173_vm1, %v163_v12 }
   0xf   :  { %326 = vmatpush3.xpose.msk.msra.mxu0 %vm38_vm0, %v27_v4 }
  0x10   :  { %327 = vmatprep.subr.msk.mxu0 %vm38_vm0, %v26_v5 }
  0x11   :  { %343 = vmatpush3.xpose.msk.msra.mxu1 %vm173_vm1, %v163_v12 }
  0x12   :  { %344 = vmatprep.subr.msk.mxu1 %vm173_vm1, %v162_v13 }
  0x13   :  { %328 = vmatpush3.xpose.msk.msra.mxu0 %vm38_vm0, %v26_v5 }
  0x14   :  { %329 = vmatprep.subr.msk.mxu0 %vm38_vm0, %v25_v6 }
  0x15   :  { %345 = vmatpush3.xpose.msk.msra.mxu1 %vm173_vm1, %v162_v13 }
  0x17   :  { %330 = vmatpush3.xpose.msk.msra.mxu0 %vm38_vm0, %v25_v6 }
  0x18   :  { %331 = vmatprep.subr.msk.mxu0 %vm38_vm0, %v24_v7 }
  0x1b   :  { %332 = vmatpush3.xpose.msk.msra.mxu0 %vm38_vm0, %v24_v7 }
  0x1c   :  { %333 = vmatprep.subr.msk.mxu0 %vm38_vm0, %v23_v8 }
  0x1f   :  { %334 = vmatpush3.xpose.msk.msra.mxu0 %vm38_vm0, %v23_v8 }
  0x22   :  { %336 = vmatmul.mubr.msk.f32.vlgmr.msra.gmra.mxu0 %vm38_vm0, %v22_v9 }
  0xe2   :  { %v337_v15 = vpop.f32.mrf.mxu0 }
  0xe3   :  { %v141_v16 = vadd.f32 %v337_v15, %v285_v14 }
  0xe4   :  { %v135_v17 = vpop.f32.mrf.mxu0 }
  0xe5   :  { %v147_v18 = vmul.f32 %v141_v16, %v141_v16  ;;  %v136_v19 = vadd.f32 %v285_v14, %v135_v17  ;;  %v145_v34 = vmul.f32 0.5, %v141_v16 }
  0xe7   :  { %v149_v20 = vmul.f32 %v147_v18, %v141_v16  ;;  %v146_v21 = vmul.f32 %v136_v19, %v136_v19  ;;  %v144_v32 = vmul.f32 0.5, %v136_v19 }
  0xe9   :  { %v151_v22 = vmul.f32 0.044715, %v149_v20  ;;  %v148_v23 = vmul.f32 %v146_v21, %v136_v19 }
  0xeb   :  { %v153_v24 = vadd.f32 %v151_v22, %v141_v16  ;;  %v150_v25 = vmul.f32 0.044715, %v148_v23 }
  0xed   :  { %v155_v26 = vmul.f32 0.7978846, %v153_v24  ;;  %v152_v27 = vadd.f32 %v150_v25, %v136_v19 }
  0xef   :  { %352 = vtanh.f32 %v155_v26  ;;  %v154_v28 = vmul.f32 0.7978846, %v152_v27 }
  0xf1   :  { %354 = vtanh.f32 %v154_v28 }
  0xfc   :  { %v353_v29 = vpop.eup %352 }
  0xfd   :  { %v159_v31 = vadd.f32 1.0, %v353_v29 }
  0xfe   :  { %v355_v30 = vpop.eup %354 }
  0xff   :  { %v158_v33 = vadd.f32 1.0, %v355_v30  ;;  %v161_v36 = vmul.f32 %v159_v31, %v145_v34 }
 0x101   :  { %v160_v35 = vmul.f32 %v158_v33, %v144_v32 }
 0x103   :  { %346 = vmatprep.mubr.msk.f32.mxu1 %vm173_vm1, %v160_v35 }
 0x104   :  { %347 = vmatmul.mubr.msk.f32.vlgmr.msra.gmra.mxu1 %vm173_vm1, %v161_v36 }
 0x1c4   :  { %v348_v38 = vpop.f32.mrf.mxu1 }
 0x1c5   :  { %v264_v39 = vadd.f32 %v348_v38, %v296_v37 }
 0x1c6   :  { %v258_v40 = vpop.f32.mrf.mxu1 }
 0x1c7   :  { %268 = vst.msk [vmem:[#allocation2 + $0x8] sm:$0xff] %vm38_vm0, %v264_v39  ;;  %v259_v41 = vadd.f32 %v296_v37, %v258_v40 }
 0x1c9   :  { %267 = vst.msk [vmem:[#allocation2] sm:$0xff] %vm38_vm0, %v259_v41 }
 0x1ca   :  { %367 = shalt.err (!%p364_p4)
}
 0x1cb   :  { %s379_s24 = smov 128   ;;  %s380_s4 = smov 8  }
 0x1cc   :  { %280 = dma.vmem_to_hbm [thread:$0]  %s275_s22, 256, %s497_s5, [#allocation3], %s379_s24, %s379_s24, %s380_s4  }
 0x1cd   :  { %376 = dma.done.wait [#allocation3], 256  }
 0x1ce   :  { %377 = vsyncadd [#allocation3], 4294967040 }
 0x1cf   :  { %284 = vsyncpa [#allocation3], 1 }

</bundles_post_ra>
